<compile_context>
chip_gen: v7x
topology: tpu7x:2x2x1
jax: 0.10.0
libtpu: 0.0.40
codegen_flags: <defaults>
</compile_context>

<pallas_src>
import functools
import math

import jax
import jax.numpy as jnp
from jax.experimental import pallas as pl
from jax.experimental.pallas import tpu as pltpu

LANE = 128                # lane width: last dim of every block
TM_MAX = 2048             # rows per block (2048*128*4B = 1 MiB per f32 block)
CHUNK_MAX = 64            # rows per inner sub-chunk (8 f32 vregs per operand)
NCORES_MAX = 2            # v7x has 2 TensorCores per chip
MIN_BLOCKS_PER_CORE = 2   # keep >=2 blocks in flight per core for pipelining


def _cdiv(a, b):
    return -(-a // b)


def _round_up(x, m):
    return _cdiv(x, m) * m


def _sublane_packing(dtype):
    # Minimum second-minor tile for this dtype is (packing, 128):
    # 8 for 4-byte, 16 for 2-byte, 32 for 1-byte elements.
    return max(8, 32 // jnp.dtype(dtype).itemsize)


@functools.lru_cache(maxsize=None)
def _num_tensorcores():
    """TensorCores per chip (2 on v7x, 1 on v5e/v6e).  Defensive: fall back to
    NCORES_MAX (the 2-way split is a harmless serial loop on single-TC chips)."""
    try:
        info = pltpu.get_tpu_info()
        for name in ("num_tensorcores", "tensorcores_per_chip",
                     "num_cores_per_chip", "num_cores", "core_count"):
            v = getattr(info, name, None)
            if isinstance(v, int) and v >= 1:
                return max(1, min(int(v), NCORES_MAX))
    except Exception:
        pass
    return NCORES_MAX


def _pick_tm(rows, ncores, packing):
    """Rows per block: large (amortize per-step pipeline overhead), a multiple
    of the dtype sublane packing / chunk granularity, and sized so the block
    count splits evenly across TensorCores for small/medium inputs."""
    nblocks = _round_up(
        max(_cdiv(rows, TM_MAX), MIN_BLOCKS_PER_CORE * ncores), ncores)
    tm = _cdiv(rows, nblocks)
    gran = CHUNK_MAX if tm >= CHUNK_MAX else packing
    return min(_round_up(tm, gran), TM_MAX)


def _gcc_sums_kernel(i_ref, j_ref, o_ref, acc_ref, *,
                     rows, spc, tm, chunk, needs_mask, unroll):
    """Accumulate per-core partial sums of I, J, I*I, J*J, I*J into (8,128)
    tiles held in a (5, 8, 128) f32 VMEM scratch."""
    p = pl.program_id(0)                     # parallel (core) axis
    s = pl.program_id(1)                     # sequential reduction axis

    @pl.when(s == 0)
    def _():
        acc_ref[...] = jnp.zeros_like(acc_ref)

    # Intended global row offset of this block (UNCLAMPED: clamped duplicate
    # tail steps of the parallel split get base_row >= rows, so the mask below
    # zeroes them out entirely).  Do not change this invariant.
    base_row = (p * spc + s) * tm
    n_chunks = tm // chunk

    def _red(x):
        # (chunk, 128) -> (chunk//8, 8, 128) -> sum over leading axis: pure
        # VPU adds; result is one vreg-sized (8, 128) tile.
        return jnp.sum(x.reshape(chunk // 8, 8, LANE), axis=0)

    def run(masked):
        if masked:
            row_iota = jax.lax.broadcasted_iota(jnp.int32, (chunk, LANE), 0)

        def step(c, carry):
            r0 = pl.multiple_of(c * chunk, chunk)
            i_c = i_ref[pl.ds(r0, chunk), :].astype(jnp.float32)
            j_c = j_ref[pl.ds(r0, chunk), :].astype(jnp.float32)
            if masked:
                # Zero rows outside the real array (partial last block and
                # fully-masked duplicated tail blocks).
                valid = row_iota < (rows - base_row - r0)
                i_c = jnp.where(valid, i_c, 0.0)
                j_c = jnp.where(valid, j_c, 0.0)
            si, sj, sii, sjj, sij = carry
            return (si + _red(i_c), sj + _red(j_c), sii + _red(i_c * i_c),
                    sjj + _red(j_c * j_c), sij + _red(i_c * j_c))

        zero = jnp.zeros((8, LANE), jnp.float32)
        carry = jax.lax.fori_loop(0, n_chunks, step, (zero,) * 5,
                                  unroll=unroll)
        # Single accumulator read-modify-write per grid step; partial tiles
        # are carried in registers inside the fori_loop.
        for k in range(5):
            acc_ref[k] += carry[k]

    if needs_mask:
        # Only the last logical block (and clamped duplicates) can be partial:
        # unmasked fast path for interior blocks, masked path otherwise.
        is_full = (base_row + tm) <= rows

        @pl.when(is_full)
        def _():
            run(masked=False)

        @pl.when(jnp.logical_not(is_full))
        def _():
            run(masked=True)
    else:
        run(masked=False)

    @pl.when(s == pl.num_programs(1) - 1)
    def _():
        o_ref[0] = acc_ref[...]


def _partial_sums(slab_i, slab_j, rows):
    """Run the Pallas kernel over a (rows, 128) slab; return (5,) f32 sums."""
    packing = max(_sublane_packing(slab_i.dtype),
                  _sublane_packing(slab_j.dtype))
    ncores_req = _num_tensorcores()

    tm = _pick_tm(rows, ncores_req, packing)
    chunk = math.gcd(tm, CHUNK_MAX)            # divides tm; multiple of 8
    nblocks = _cdiv(rows, tm)
    ncores = min(ncores_req, nblocks)
    spc = _cdiv(nblocks, ncores)               # reduction steps per core
    needs_mask = (rows % tm != 0) or (nblocks % ncores != 0)
    unroll = 2 if (tm // chunk) > 1 else 1

    def in_index_map(p, s):
        # Clamp so duplicated tail steps stay in range; they are masked to
        # zero inside the kernel via the (unclamped) base_row.
        return (jnp.minimum(p * spc + s, nblocks - 1), 0)

    kernel = functools.partial(
        _gcc_sums_kernel, rows=rows, spc=spc, tm=tm, chunk=chunk,
        needs_mask=needs_mask, unroll=unroll)

    # Explicit scoped-VMEM budget (mainly so v5e's 16 MiB default never bites
    # if TM_MAX is raised): 2 pipeline buffers x 2 input blocks + scratch +
    # double-buffered output, with generous margin.
    block_bytes = tm * LANE * (slab_i.dtype.itemsize + slab_j.dtype.itemsize)
    est = 2 * block_bytes + 8 * (5 * 8 * LANE * 4)
    vmem_limit = int(min(max(3 * est, 32 << 20), 48 << 20))

    partials = pl.pallas_call(
        kernel,
        out_shape=jax.ShapeDtypeStruct((ncores, 5, 8, LANE), jnp.float32),
        grid_spec=pltpu.PrefetchScalarGridSpec(
            num_scalar_prefetch=0,
            grid=(ncores, spc),
            in_specs=[
                pl.BlockSpec((tm, LANE), in_index_map),
                pl.BlockSpec((tm, LANE), in_index_map),
            ],
            out_specs=pl.BlockSpec((1, 5, 8, LANE), lambda p, s: (p, 0, 0, 0)),
            scratch_shapes=[pltpu.VMEM((5, 8, LANE), jnp.float32)],
        ),
        compiler_params=pltpu.CompilerParams(
            dimension_semantics=("parallel", "arbitrary"),
            vmem_limit_bytes=vmem_limit,
        ),
    )(slab_i, slab_j)

    # TODO(synk): the (ncores,5,8,128)->(5,) reduce could be folded into the
    # kernel's last step (free XLU slot); only matters when dispatch-bound.
    return jnp.sum(partials, axis=(0, 2, 3))           # (5,)


def gcc(I, J, eps=1e-5):
    """Global normalized cross correlation loss: -cc + 1 (scalar, f32)."""
    assert I.shape == J.shape, "I and J must have the same shape"
    n_total = int(I.size)
    assert n_total > 0

    flat_i = jnp.reshape(I, (-1,))
    flat_j = jnp.reshape(J, (-1,))

    rows = n_total // LANE
    rem = n_total - rows * LANE

    if rows > 0:
        slab_i = jnp.reshape(flat_i[: rows * LANE] if rem else flat_i,
                             (rows, LANE))
        slab_j = jnp.reshape(flat_j[: rows * LANE] if rem else flat_j,
                             (rows, LANE))
        sums = _partial_sums(slab_i, slab_j, rows)
    else:
        sums = jnp.zeros((5,), jnp.float32)

    if rem:   # < 128 leftover elements: tiny epilogue contribution
        t_i = flat_i[rows * LANE:].astype(jnp.float32)
        t_j = flat_j[rows * LANE:].astype(jnp.float32)
        sums = sums + jnp.stack([
            jnp.sum(t_i), jnp.sum(t_j),
            jnp.sum(t_i * t_i), jnp.sum(t_j * t_j), jnp.sum(t_i * t_j)])

    inv_n = jnp.float32(1.0 / n_total)
    i_ave = sums[0] * inv_n
    j_ave = sums[1] * inv_n
    i2_ave = sums[2] * inv_n
    j2_ave = sums[3] * inv_n
    ij_ave = sums[4] * inv_n

    cross = ij_ave - i_ave * j_ave
    i_var = i2_ave - i_ave * i_ave   # may cancel toward ~0, matching the
    j_var = j2_ave - j_ave * j_ave   # PyTorch reference exactly
    cc = cross / (jnp.sqrt(i_var) * jnp.sqrt(j_var) + jnp.float32(eps))
    return -1.0 * cc + 1.0


def gcc_ref(I, J, eps=1e-5):
    I = I.astype(jnp.float32)
    J = J.astype(jnp.float32)
    I_ave, J_ave = I.mean(), J.mean()
    I2_ave, J2_ave = (I * I).mean(), (J * J).mean()
    IJ_ave = (I * J).mean()
    cross = IJ_ave - I_ave * J_ave
    I_var = I2_ave - I_ave * I_ave
    J_var = J2_ave - J_ave * J_ave
    cc = cross / (jnp.sqrt(I_var) * jnp.sqrt(J_var) + eps)
    return -1.0 * cc + 1.0


if __name__ == "__main__":
    key = jax.random.PRNGKey(0)
    k1, k2, k3, k4, k5, k6 = jax.random.split(key, 6)

    gcc_fn = jax.jit(gcc)

    # Small NCHW case (what the PyTorch module typically receives).
    # rows=16 divides evenly -> pure unmasked fast path, balanced 2-way split.
    I1 = jax.random.normal(k1, (2, 4, 16, 16), dtype=jnp.float32)
    J1 = 0.7 * I1 + 0.3 * jax.random.normal(k2, (2, 4, 16, 16), dtype=jnp.float32)
    out1 = gcc_fn(I1, J1)
    jax.block_until_ready(out1)
    ref1 = gcc_ref(I1, J1)
    assert jnp.allclose(out1, ref1, atol=1e-5, rtol=1e-5), (out1, ref1)

    # Odd-sized case: exercises the partial last block (masked slow path),
    # the interior-block fast path, and the <128-element tail epilogue.
    n_odd = 1025 * LANE + 37
    I2 = jax.random.normal(k3, (n_odd,), dtype=jnp.float32)
    J2 = 0.5 * I2 + 0.5 * jax.random.normal(k4, (n_odd,), dtype=jnp.float32)
    out2 = gcc_fn(I2, J2)
    jax.block_until_ready(out2)
    ref2 = gcc_ref(I2, J2)
    assert jnp.allclose(out2, ref2, atol=1e-4, rtol=1e-4), (out2, ref2)

    # bf16 case: exercises the dtype-aware (16,128) sublane packing for tm,
    # a partial last block, and the tail epilogue.
    I3 = jax.random.normal(k5, (3, 5, 17, 29), dtype=jnp.bfloat16)
    J3 = (0.6 * I3.astype(jnp.float32)
          + 0.4 * jax.random.normal(k6, (3, 5, 17, 29))).astype(jnp.bfloat16)
    out3 = gcc_fn(I3, J3)
    jax.block_until_ready(out3)
    ref3 = gcc_ref(I3, J3)
    assert jnp.allclose(out3, ref3, atol=1e-4, rtol=1e-4), (out3, ref3)

    print("KERNEL_OK")
</pallas_src>

<mosaic_0001>
module attributes {stable_mosaic.version = 11 : i64} {
  func.func @_gcc_sums_kernel(%arg0: i32, %arg1: i32, %arg2: memref<8x128xf32, #tpu.memory_space<vmem>>, %arg3: memref<8x128xf32, #tpu.memory_space<vmem>>, %arg4: memref<1x5x8x128xf32, #tpu.memory_space<vmem>>, %arg5: memref<5x8x128xf32, #tpu.memory_space<vmem>>) attributes {dimension_semantics = [#tpu.dimension_semantics<parallel>, #tpu.dimension_semantics<arbitrary>], iteration_bounds = array<i64: 2, 1>, scalar_prefetch = 0 : i64, scratch_operands = 1 : i64, tpu.core_type = #tpu.core_type<tc>, window_params = [{transform_indices = @transform_0, window_bounds = array<i64: 8, 128>}, {transform_indices = @transform_1, window_bounds = array<i64: 8, 128>}, {transform_indices = @transform_2, window_bounds = array<i64: 1, 5, 8, 128>}]} {
    %c0_i32 = arith.constant 0 : i32
    %0 = arith.cmpi eq, %arg1, %c0_i32 : i32
    %1 = arith.extui %0 : i1 to i32
    %c0_i32_0 = arith.constant 0 : i32
    %2 = arith.cmpi ne, %1, %c0_i32_0 : i32
    scf.if %2 {
      %cst_36 = arith.constant 0.000000e+00 : f32
      %61 = vector.broadcast %cst_36 : f32 to vector<5x8x128xf32>
      %c0_37 = arith.constant 0 : index
      %c0_38 = arith.constant 0 : index
      %c0_39 = arith.constant 0 : index
      %62 = vector.load %arg5[%c0_37, %c0_38, %c0_39] : memref<5x8x128xf32, #tpu.memory_space<vmem>>, vector<5x8x128xf32>
      tpu.vector_store %arg5[%c0_37, %c0_38, %c0_39], %61 {strides = array<i32>} : memref<5x8x128xf32, #tpu.memory_space<vmem>>, vector<5x8x128xf32>,
    } else {
    }
    %cst = arith.constant 0.000000e+00 : f32
    %3 = vector.broadcast %cst : f32 to vector<8x128xf32>
    %c0_i32_1 = arith.constant 0 : i32
    %c8_i32 = arith.constant 8 : i32
    %4 = arith.muli %c0_i32_1, %c8_i32 : i32
    %5 = tpu.assume_multiple %4, 8 : i32
    %6 = arith.index_cast %5 : i32 to index
    %c0 = arith.constant 0 : index
    %7 = vector.load %arg2[%6, %c0] : memref<8x128xf32, #tpu.memory_space<vmem>>, vector<8x128xf32>
    %8 = arith.index_cast %5 : i32 to index
    %c0_2 = arith.constant 0 : index
    %9 = vector.load %arg3[%8, %c0_2] : memref<8x128xf32, #tpu.memory_space<vmem>>, vector<8x128xf32>
    %10 = vector.shape_cast %7 : vector<8x128xf32> to vector<1x8x128xf32>
    %cst_3 = arith.constant dense<0.000000e+00> : vector<8x128xf32>
    %11 = vector.multi_reduction <add>, %10, %cst_3 [0] : vector<1x8x128xf32> to vector<8x128xf32>
    %12 = arith.addf %3, %11 : vector<8x128xf32>
    %13 = vector.shape_cast %9 : vector<8x128xf32> to vector<1x8x128xf32>
    %cst_4 = arith.constant dense<0.000000e+00> : vector<8x128xf32>
    %14 = vector.multi_reduction <add>, %13, %cst_4 [0] : vector<1x8x128xf32> to vector<8x128xf32>
    %15 = arith.addf %3, %14 : vector<8x128xf32>
    %16 = arith.mulf %7, %7 : vector<8x128xf32>
    %17 = vector.shape_cast %16 : vector<8x128xf32> to vector<1x8x128xf32>
    %cst_5 = arith.constant dense<0.000000e+00> : vector<8x128xf32>
    %18 = vector.multi_reduction <add>, %17, %cst_5 [0] : vector<1x8x128xf32> to vector<8x128xf32>
    %19 = arith.addf %3, %18 : vector<8x128xf32>
    %20 = arith.mulf %9, %9 : vector<8x128xf32>
    %21 = vector.shape_cast %20 : vector<8x128xf32> to vector<1x8x128xf32>
    %cst_6 = arith.constant dense<0.000000e+00> : vector<8x128xf32>
    %22 = vector.multi_reduction <add>, %21, %cst_6 [0] : vector<1x8x128xf32> to vector<8x128xf32>
    %23 = arith.addf %3, %22 : vector<8x128xf32>
    %24 = arith.mulf %7, %9 : vector<8x128xf32>
    %25 = vector.shape_cast %24 : vector<8x128xf32> to vector<1x8x128xf32>
    %cst_7 = arith.constant dense<0.000000e+00> : vector<8x128xf32>
    %26 = vector.multi_reduction <add>, %25, %cst_7 [0] : vector<1x8x128xf32> to vector<8x128xf32>
    %27 = arith.addf %3, %26 : vector<8x128xf32>
    %c1_i32 = arith.constant 1 : i32
    %c0_8 = arith.constant 0 : index
    %c0_9 = arith.constant 0 : index
    %c0_10 = arith.constant 0 : index
    %28 = vector.load %arg5[%c0_8, %c0_9, %c0_10] : memref<5x8x128xf32, #tpu.memory_space<vmem>>, vector<1x8x128xf32>
    %29 = vector.shape_cast %28 : vector<1x8x128xf32> to vector<8x128xf32>
    %30 = arith.addf %29, %12 : vector<8x128xf32>
    %c0_11 = arith.constant 0 : index
    %c0_12 = arith.constant 0 : index
    %c0_13 = arith.constant 0 : index
    %31 = vector.load %arg5[%c0_11, %c0_12, %c0_13] : memref<5x8x128xf32, #tpu.memory_space<vmem>>, vector<1x8x128xf32>
    %32 = vector.shape_cast %31 : vector<1x8x128xf32> to vector<8x128xf32>
    %33 = vector.shape_cast %30 : vector<8x128xf32> to vector<1x8x128xf32>
    tpu.vector_store %arg5[%c0_11, %c0_12, %c0_13], %33 {strides = array<i32>} : memref<5x8x128xf32, #tpu.memory_space<vmem>>, vector<1x8x128xf32>,
    %c1 = arith.constant 1 : index
    %c0_14 = arith.constant 0 : index
    %c0_15 = arith.constant 0 : index
    %34 = vector.load %arg5[%c1, %c0_14, %c0_15] : memref<5x8x128xf32, #tpu.memory_space<vmem>>, vector<1x8x128xf32>
    %35 = vector.shape_cast %34 : vector<1x8x128xf32> to vector<8x128xf32>
    %36 = arith.addf %35, %15 : vector<8x128xf32>
    %c1_16 = arith.constant 1 : index
    %c0_17 = arith.constant 0 : index
    %c0_18 = arith.constant 0 : index
    %37 = vector.load %arg5[%c1_16, %c0_17, %c0_18] : memref<5x8x128xf32, #tpu.memory_space<vmem>>, vector<1x8x128xf32>
    %38 = vector.shape_cast %37 : vector<1x8x128xf32> to vector<8x128xf32>
    %39 = vector.shape_cast %36 : vector<8x128xf32> to vector<1x8x128xf32>
    tpu.vector_store %arg5[%c1_16, %c0_17, %c0_18], %39 {strides = array<i32>} : memref<5x8x128xf32, #tpu.memory_space<vmem>>, vector<1x8x128xf32>,
    %c2 = arith.constant 2 : index
    %c0_19 = arith.constant 0 : index
    %c0_20 = arith.constant 0 : index
    %40 = vector.load %arg5[%c2, %c0_19, %c0_20] : memref<5x8x128xf32, #tpu.memory_space<vmem>>, vector<1x8x128xf32>
    %41 = vector.shape_cast %40 : vector<1x8x128xf32> to vector<8x128xf32>
    %42 = arith.addf %41, %19 : vector<8x128xf32>
    %c2_21 = arith.constant 2 : index
    %c0_22 = arith.constant 0 : index
    %c0_23 = arith.constant 0 : index
    %43 = vector.load %arg5[%c2_21, %c0_22, %c0_23] : memref<5x8x128xf32, #tpu.memory_space<vmem>>, vector<1x8x128xf32>
    %44 = vector.shape_cast %43 : vector<1x8x128xf32> to vector<8x128xf32>
    %45 = vector.shape_cast %42 : vector<8x128xf32> to vector<1x8x128xf32>
    tpu.vector_store %arg5[%c2_21, %c0_22, %c0_23], %45 {strides = array<i32>} : memref<5x8x128xf32, #tpu.memory_space<vmem>>, vector<1x8x128xf32>,
    %c3 = arith.constant 3 : index
    %c0_24 = arith.constant 0 : index
    %c0_25 = arith.constant 0 : index
    %46 = vector.load %arg5[%c3, %c0_24, %c0_25] : memref<5x8x128xf32, #tpu.memory_space<vmem>>, vector<1x8x128xf32>
    %47 = vector.shape_cast %46 : vector<1x8x128xf32> to vector<8x128xf32>
    %48 = arith.addf %47, %23 : vector<8x128xf32>
    %c3_26 = arith.constant 3 : index
    %c0_27 = arith.constant 0 : index
    %c0_28 = arith.constant 0 : index
    %49 = vector.load %arg5[%c3_26, %c0_27, %c0_28] : memref<5x8x128xf32, #tpu.memory_space<vmem>>, vector<1x8x128xf32>
    %50 = vector.shape_cast %49 : vector<1x8x128xf32> to vector<8x128xf32>
    %51 = vector.shape_cast %48 : vector<8x128xf32> to vector<1x8x128xf32>
    tpu.vector_store %arg5[%c3_26, %c0_27, %c0_28], %51 {strides = array<i32>} : memref<5x8x128xf32, #tpu.memory_space<vmem>>, vector<1x8x128xf32>,
    %c4 = arith.constant 4 : index
    %c0_29 = arith.constant 0 : index
    %c0_30 = arith.constant 0 : index
    %52 = vector.load %arg5[%c4, %c0_29, %c0_30] : memref<5x8x128xf32, #tpu.memory_space<vmem>>, vector<1x8x128xf32>
    %53 = vector.shape_cast %52 : vector<1x8x128xf32> to vector<8x128xf32>
    %54 = arith.addf %53, %27 : vector<8x128xf32>
    %c4_31 = arith.constant 4 : index
    %c0_32 = arith.constant 0 : index
    %c0_33 = arith.constant 0 : index
    %55 = vector.load %arg5[%c4_31, %c0_32, %c0_33] : memref<5x8x128xf32, #tpu.memory_space<vmem>>, vector<1x8x128xf32>
    %56 = vector.shape_cast %55 : vector<1x8x128xf32> to vector<8x128xf32>
    %57 = vector.shape_cast %54 : vector<8x128xf32> to vector<1x8x128xf32>
    tpu.vector_store %arg5[%c4_31, %c0_32, %c0_33], %57 {strides = array<i32>} : memref<5x8x128xf32, #tpu.memory_space<vmem>>, vector<1x8x128xf32>,
    %c0_i32_34 = arith.constant 0 : i32
    %58 = arith.cmpi eq, %arg1, %c0_i32_34 : i32
    %59 = arith.extui %58 : i1 to i32
    %c0_i32_35 = arith.constant 0 : i32
    %60 = arith.cmpi ne, %59, %c0_i32_35 : i32
    scf.if %60 {
      %c0_36 = arith.constant 0 : index
      %c0_37 = arith.constant 0 : index
      %c0_38 = arith.constant 0 : index
      %61 = vector.load %arg5[%c0_36, %c0_37, %c0_38] : memref<5x8x128xf32, #tpu.memory_space<vmem>>, vector<5x8x128xf32>
      %c0_39 = arith.constant 0 : index
      %c0_40 = arith.constant 0 : index
      %c0_41 = arith.constant 0 : index
      %c0_42 = arith.constant 0 : index
      %62 = vector.load %arg4[%c0_39, %c0_40, %c0_41, %c0_42] : memref<1x5x8x128xf32, #tpu.memory_space<vmem>>, vector<1x5x8x128xf32>
      %63 = vector.shape_cast %62 : vector<1x5x8x128xf32> to vector<5x8x128xf32>
      %64 = vector.shape_cast %61 : vector<5x8x128xf32> to vector<1x5x8x128xf32>
      tpu.vector_store %arg4[%c0_39, %c0_40, %c0_41, %c0_42], %64 {strides = array<i32>} : memref<1x5x8x128xf32, #tpu.memory_space<vmem>>, vector<1x5x8x128xf32>,
    } else {
    }
    return
  }
  func.func @transform_0(%arg0: i32, %arg1: i32) -> (i32, i32) {
    %c1_i32 = arith.constant 1 : i32
    %0 = arith.muli %arg0, %c1_i32 : i32
    %1 = arith.addi %0, %arg1 : i32
    %c1_i32_0 = arith.constant 1 : i32
    %2 = arith.minsi %1, %c1_i32_0 : i32
    %c0_i32 = arith.constant 0 : i32
    %c0_i32_1 = arith.constant 0 : i32
    return %2, %c0_i32 : i32, i32
  }
  func.func @transform_1(%arg0: i32, %arg1: i32) -> (i32, i32) {
    %c1_i32 = arith.constant 1 : i32
    %0 = arith.muli %arg0, %c1_i32 : i32
    %1 = arith.addi %0, %arg1 : i32
    %c1_i32_0 = arith.constant 1 : i32
    %2 = arith.minsi %1, %c1_i32_0 : i32
    %c0_i32 = arith.constant 0 : i32
    %c0_i32_1 = arith.constant 0 : i32
    return %2, %c0_i32 : i32, i32
  }
  func.func @transform_2(%arg0: i32, %arg1: i32) -> (i32, i32, i32, i32) {
    %c0_i32 = arith.constant 0 : i32
    %c0_i32_0 = arith.constant 0 : i32
    %c0_i32_1 = arith.constant 0 : i32
    %c0_i32_2 = arith.constant 0 : i32
    return %arg0, %c0_i32, %c0_i32_0, %c0_i32_1 : i32, i32, i32, i32
  }
}

</mosaic_0001>

<bundles_post_ra>
// kernel: gcc.1
= control target key start
LH: loop header
LB: loop body
LE: loop exit
PB: predicated region body
PF: predicated region fallthrough
CT: control target
= control target key end

     0   :  { %s423_s9 = smov 0   ;;  %s425_s10 = smov 0   ;;  %s456_s0 = inlined_call_operand.vmem [shape: f32[16,128], index: 0, kind: input, shape index: {}]   ;;  %s457_s1 = inlined_call_operand.vmem [shape: f32[16,128], index: 1, kind: input, shape index: {}]   ;;  %s458_s2 = inlined_call_operand.vmem [shape: f32[2,5,8,128], index: 2, kind: output, shape index: {}]  }
   0x1   :  { %s427_s11 = smov 0  }
   0x2 LB: > { %s24_s12 = sadd.s32 1, %s402_s10  ;;  %p347_p0 = scmp.ge.s32.totalorder %s406_s11, 1  ;;  %s406_s11 = sphi %s427_s11, %s12_s11   ;;  %s402_s10 = sphi %s425_s10, %s460_s10   ;;  %s398_s9 = sphi %s423_s9, %s459_s9  }
   0x3   : > { %p26_p1 = scmp.ge.s32.totalorder %s24_s12, 2  ;;  %p156_p2 = scmp.lt.s32.totalorder %s406_s11, 3 }
   0x5   : > { %s462_s12 = smov (%p26_p1, %s24_s12), 0  ;;  %p157_p3 = pnand %p347_p0, %p156_p2 }
   0x6   : > { %p188_p4 = scmp.lt.s32.totalorder (!%p157_p3), %s398_s9, 1 }
   0x7   : > { %160 = sbr.rel (%p157_p3) target bundleno = 24 (0x18), region = 28 }
   0xe   : > { %s464_s9 = smov (!%p188_p4, %s398_s9), 1 }
   0xf   : > { %s191_s13 = scalar_select %p188_p4, %s464_s9, 1 }
  0x10   : > { %s359_s14 = smul.u32 40, %s464_s9 }
  0x11   : > { %s351_s15 = sshll.u32 %s191_s13, 3 }
  0x12   : > { %s193_s18 = scalar_lea.vmem %s456_s0, %s351_s15  ;;  %s211_s21 = scalar_lea.vmem %s458_s2, %s359_s14 }
  0x13   : > { %v221_v0 = vld [vmem:[%s193_s18] sm:$0xff]  ;;  %s203_s24 = scalar_lea.vmem %s457_s1, %s351_s15 }
  0x14   : > { %263 = vst [vmem:[%s211_s21] sm:$0xff] %v221_v0  ;;  %v222_v1 = vld [vmem:[%s203_s24] sm:$0xff]  ;;  %v227_v2 = vmul.f32 %v221_v0, %v221_v0 }
  0x15   : > { %264 = vst [vmem:[%s211_s21 + $0x8] sm:$0xff] %v222_v1  ;;  %v230_v3 = vmul.f32 %v222_v1, %v222_v1  ;;  %v233_v4 = vmul.f32 %v222_v1, %v221_v0 }
  0x16   : > { %265 = vst [vmem:[%s211_s21 + $0x10] sm:$0xff] %v227_v2 }
  0x17   : > { %266 = vst [vmem:[%s211_s21 + $0x18] sm:$0xff] %v230_v3  ;;  %267 = vst [vmem:[%s211_s21 + $0x20] sm:$0xff] %v233_v4 }
  0x18 PF: > { %s12_s11 = sadd.s32 1, %s406_s11   ;;  %s459_s9 = smov %s402_s10 }
  0x19   : > { %p9_p5 = scmp.ge.s32.totalorder %s12_s11, 4   ;;  %s460_s10 = smov %s462_s12 }
  0x1b   :  { %11 = sbr.rel (!%p9_p5) target bundleno = 2 (0x2), region = 73 }

</bundles_post_ra>
